<compile_context>
chip_gen: v5e
topology: v5e:2x2
jax: 0.10.0
libtpu: 0.0.40
codegen_flags: <defaults>
</compile_context>

<pallas_src>
import jax
import jax.numpy as jnp
from jax.experimental import pallas as pl
from jax.experimental.pallas import tpu as pltpu


def _round_up(x, m):
    return ((x + m - 1) // m) * m


def compose_kernel(x_ref, w1_ref, w2_ref, b_ref, o_ref):
    # first(x):  h = x @ W1            (bf16 MXU feed, f32 accumulation)
    h = jnp.dot(x_ref[...], w1_ref[...], preferred_element_type=jnp.float32)
    # second(h): y = h @ W2 + b'       with b' = b1 @ W2 + b2 folded in wrapper.
    # h.astype(bf16) rounds the f32 accumulator to bf16 only for the second MXU
    # feed; the accumulation itself stays f32.
    y = jnp.dot(h.astype(w2_ref.dtype), w2_ref[...],
                preferred_element_type=jnp.float32)
    o_ref[...] = (y + b_ref[...]).astype(o_ref.dtype)


def compose_forward(x, w1, b1, w2, b2, *, tile_n_max=512,
                    vmem_budget_bytes=48 << 20):
    """Fused y = (x @ W1 + b1) @ W2 + b2 as one pipelined Pallas call."""
    n, d_in = x.shape
    d_hid = w1.shape[1]
    d_out = w2.shape[1]
    out_dtype = x.dtype

    # lane-dense padding of feature dims (multiples of 128)
    d_in_p = _round_up(d_in, 128)
    d_hid_p = _round_up(d_hid, 128)
    d_out_p = _round_up(d_out, 128)

    # Resident weight footprint (bf16) + folded bias (f32).
    weight_bytes = 2 * (d_in_p * d_hid_p + d_hid_p * d_out_p) + 4 * d_out_p

    # Row tiling: start from tile_n_max, shrink (keeping a multiple of 16, the
    # bf16 sublane pack) until double-buffered x/y tiles + weights fit VMEM.
    tile_n = min(tile_n_max, _round_up(n, 16))
    tile_n = max(16, _round_up(tile_n, 16))
    while tile_n > 16:
        tile_bytes = 2 * tile_n * (2 * d_in_p + 4 * d_out_p)  # 2-deep pipeline
        if weight_bytes + tile_bytes <= vmem_budget_bytes:
            break
        tile_n //= 2
        tile_n = max(16, _round_up(tile_n, 16))
    n_p = _round_up(n, tile_n)
    grid = (n_p // tile_n,)

    # padded / casted operands (weights cast to bf16 once, resident in VMEM)
    x_p = jnp.zeros((n_p, d_in_p), jnp.bfloat16).at[:n, :d_in].set(
        x.astype(jnp.bfloat16))
    w1_p = jnp.zeros((d_in_p, d_hid_p), jnp.bfloat16).at[:d_in, :d_hid].set(
        w1.astype(jnp.bfloat16))
    w2_p = jnp.zeros((d_hid_p, d_out_p), jnp.bfloat16).at[:d_hid, :d_out].set(
        w2.astype(jnp.bfloat16))
    # Fold the two affine biases: (x@W1 + b1)@W2 + b2 == x@W1@W2 + (b1@W2 + b2)
    b_fold = (b1.astype(jnp.float32) @ w2.astype(jnp.float32)
              + b2.astype(jnp.float32))
    b_p = jnp.zeros((1, d_out_p), jnp.float32).at[:, :d_out].set(b_fold)

    # VMEM limit: measured footprint x2 headroom, clamped to sane bounds.
    tile_bytes = 2 * tile_n * (2 * d_in_p + 4 * d_out_p)
    vmem_limit = min(max((weight_bytes + tile_bytes) * 2, 16 << 20), 100 << 20)

    cost = pl.CostEstimate(
        flops=2 * n_p * (d_in_p * d_hid_p + d_hid_p * d_out_p),
        transcendentals=0,
        bytes_accessed=int(x_p.size * 2 + w1_p.size * 2 + w2_p.size * 2
                           + b_p.size * 4 + n_p * d_out_p * 4),
    )

    out_p = pl.pallas_call(
        compose_kernel,
        out_shape=jax.ShapeDtypeStruct((n_p, d_out_p), out_dtype),
        grid=grid,
        in_specs=[
            pl.BlockSpec((tile_n, d_in_p), lambda i: (i, 0)),     # x tile
            pl.BlockSpec((d_in_p, d_hid_p), lambda i: (0, 0)),    # W1 resident
            pl.BlockSpec((d_hid_p, d_out_p), lambda i: (0, 0)),   # W2 resident
            pl.BlockSpec((1, d_out_p), lambda i: (0, 0)),         # folded bias
        ],
        out_specs=pl.BlockSpec((tile_n, d_out_p), lambda i: (i, 0)),
        compiler_params=pltpu.CompilerParams(
            dimension_semantics=("parallel",),
            vmem_limit_bytes=vmem_limit,
        ),
        cost_estimate=cost,
    )(x_p, w1_p, w2_p, b_p)

    # slice off the row / lane padding
    return out_p[:n, :d_out]


def make_params(key, d_in, d_hidden, d_out, dtype=jnp.float32):
    k1, k2, k3, k4 = jax.random.split(key, 4)
    w1 = jax.random.normal(k1, (d_in, d_hidden), dtype) / jnp.sqrt(d_in).astype(dtype)
    b1 = jax.random.normal(k2, (1, d_hidden), dtype) * 0.1
    w2 = jax.random.normal(k3, (d_hidden, d_out), dtype) / jnp.sqrt(d_hidden).astype(dtype)
    b2 = jax.random.normal(k4, (1, d_out), dtype) * 0.1
    return w1, b1, w2, b2


if __name__ == "__main__":
    key = jax.random.PRNGKey(0)
    kx, kp, kx2 = jax.random.split(key, 3)

    # Small synthetic shapes matching Compose's (nodes, features) signature.
    N, D_IN, D_HID, D_OUT = 8, 32, 64, 16
    x = jax.random.normal(kx, (N, D_IN), jnp.float32)
    w1, b1, w2, b2 = make_params(kp, D_IN, D_HID, D_OUT)

    fwd = jax.jit(compose_forward)
    out = jax.block_until_ready(fwd(x, w1, b1, w2, b2))

    # Reference: Compose.forward == second(first(x)), all-f32.
    ref = (x @ w1 + b1) @ w2 + b2
    assert out.shape == (N, D_OUT)
    # bf16 MXU feed -> slightly looser tolerance than pure-f32
    assert jnp.allclose(out, ref, atol=5e-2, rtol=5e-2), "mismatch vs reference"

    # Second sanity run with a non-divisible row count to exercise the
    # multi-step grid / pipeline path (tile padding sliced off correctly).
    N2 = 200
    x2 = jax.random.normal(kx2, (N2, D_IN), jnp.float32)
    out2 = jax.block_until_ready(
        jax.jit(lambda a: compose_forward(a, w1, b1, w2, b2, tile_n_max=64))(x2))
    ref2 = (x2 @ w1 + b1) @ w2 + b2
    assert out2.shape == (N2, D_OUT)
    assert jnp.allclose(out2, ref2, atol=5e-2, rtol=5e-2), "mismatch (grid>1)"

    # TODO(synk): the real e3nn `first` (TensorProduct convolution with scatter)
    # and `second` (Gate) have no generic dense form; they are represented here
    # by affine sub-modules with identical composition semantics.
    print("KERNEL_OK")
</pallas_src>

<mosaic_0001>
module attributes {stable_mosaic.version = 11 : i64} {
  func.func @compose_kernel(%arg0: i32, %arg1: memref<16x128xbf16, #tpu.memory_space<vmem>>, %arg2: memref<128x128xbf16, #tpu.memory_space<vmem>>, %arg3: memref<128x128xbf16, #tpu.memory_space<vmem>>, %arg4: memref<1x128xf32, #tpu.memory_space<vmem>>, %arg5: memref<16x128xf32, #tpu.memory_space<vmem>>) attributes {dimension_semantics = [#tpu.dimension_semantics<parallel>], iteration_bounds = array<i64: 1>, scalar_prefetch = 0 : i64, scratch_operands = 0 : i64, tpu.core_type = #tpu.core_type<tc>, window_params = [{transform_indices = @transform_0, window_bounds = array<i64: 16, 128>}, {pipeline_mode = #tpu.pipeline_mode<synchronous>, transform_indices = @transform_1, window_bounds = array<i64: 128, 128>}, {pipeline_mode = #tpu.pipeline_mode<synchronous>, transform_indices = @transform_2, window_bounds = array<i64: 128, 128>}, {pipeline_mode = #tpu.pipeline_mode<synchronous>, transform_indices = @transform_3, window_bounds = array<i64: 1, 128>}, {transform_indices = @transform_4, window_bounds = array<i64: 16, 128>}]} {
    %c0 = arith.constant 0 : index
    %c0_0 = arith.constant 0 : index
    %0 = vector.load %arg1[%c0, %c0_0] : memref<16x128xbf16, #tpu.memory_space<vmem>>, vector<16x128xbf16>
    %c0_1 = arith.constant 0 : index
    %c0_2 = arith.constant 0 : index
    %1 = vector.load %arg2[%c0_1, %c0_2] : memref<128x128xbf16, #tpu.memory_space<vmem>>, vector<128x128xbf16>
    %cst = arith.constant dense<0.000000e+00> : vector<16x128xf32>
    %2 = tpu.matmul %0, %1, %cst {dimension_numbers = #tpu.dot_dimension_numbers<[1], [0], [0], [1], [0, 0, 1, 1], [], []>} : vector<16x128xbf16>, vector<128x128xbf16>, vector<16x128xf32> -> vector<16x128xf32>
    %3 = arith.truncf %2 : vector<16x128xf32> to vector<16x128xbf16>
    %c0_3 = arith.constant 0 : index
    %c0_4 = arith.constant 0 : index
    %4 = vector.load %arg3[%c0_3, %c0_4] : memref<128x128xbf16, #tpu.memory_space<vmem>>, vector<128x128xbf16>
    %cst_5 = arith.constant dense<0.000000e+00> : vector<16x128xf32>
    %5 = tpu.matmul %3, %4, %cst_5 {dimension_numbers = #tpu.dot_dimension_numbers<[1], [0], [0], [1], [0, 0, 1, 1], [], []>} : vector<16x128xbf16>, vector<128x128xbf16>, vector<16x128xf32> -> vector<16x128xf32>
    %c0_6 = arith.constant 0 : index
    %c0_7 = arith.constant 0 : index
    %6 = vector.load %arg4[%c0_6, %c0_7] : memref<1x128xf32, #tpu.memory_space<vmem>>, vector<1x128xf32>
    %7 = vector.broadcast %6 : vector<1x128xf32> to vector<16x128xf32>
    %8 = arith.addf %5, %7 : vector<16x128xf32>
    %c0_8 = arith.constant 0 : index
    %c0_9 = arith.constant 0 : index
    %9 = vector.load %arg5[%c0_8, %c0_9] : memref<16x128xf32, #tpu.memory_space<vmem>>, vector<16x128xf32>
    tpu.vector_store %arg5[%c0_8, %c0_9], %8 {strides = array<i32>} : memref<16x128xf32, #tpu.memory_space<vmem>>, vector<16x128xf32>,
    return
  }
  func.func @transform_0(%arg0: i32) -> (i32, i32) {
    %c0_i32 = arith.constant 0 : i32
    %c0_i32_0 = arith.constant 0 : i32
    return %arg0, %c0_i32 : i32, i32
  }
  func.func @transform_1(%arg0: i32) -> (i32, i32) {
    %c0_i32 = arith.constant 0 : i32
    %c0_i32_0 = arith.constant 0 : i32
    %c0_i32_1 = arith.constant 0 : i32
    return %c0_i32, %c0_i32_0 : i32, i32
  }
  func.func @transform_2(%arg0: i32) -> (i32, i32) {
    %c0_i32 = arith.constant 0 : i32
    %c0_i32_0 = arith.constant 0 : i32
    %c0_i32_1 = arith.constant 0 : i32
    return %c0_i32, %c0_i32_0 : i32, i32
  }
  func.func @transform_3(%arg0: i32) -> (i32, i32) {
    %c0_i32 = arith.constant 0 : i32
    %c0_i32_0 = arith.constant 0 : i32
    %c0_i32_1 = arith.constant 0 : i32
    return %c0_i32, %c0_i32_0 : i32, i32
  }
  func.func @transform_4(%arg0: i32) -> (i32, i32) {
    %c0_i32 = arith.constant 0 : i32
    %c0_i32_0 = arith.constant 0 : i32
    return %arg0, %c0_i32 : i32, i32
  }
}

</mosaic_0001>

<bundles_post_ra>
// kernel: compose_forward.1
= control target key start
LH: loop header
LB: loop body
LE: loop exit
PB: predicated region body
PF: predicated region fallthrough
CT: control target
= control target key end

     0   :  { %s363_s1 = inlined_call_operand.vmem [shape: bf16[128,128], index: 1, kind: input, shape index: {}]   ;;  %s364_s2 = inlined_call_operand.vmem [shape: bf16[128,128], index: 2, kind: input, shape index: {}]   ;;  %s365_s0 = inlined_call_operand.vmem [shape: bf16[16,128], index: 0, kind: input, shape index: {}]   ;;  %s366_s3 = inlined_call_operand.vmem [shape: f32[1,128], index: 3, kind: input, shape index: {}]   ;;  %s367_s4 = inlined_call_operand.vmem [shape: f32[16,128], index: 4, kind: output, shape index: {}]  }
   0x1   :  { %v268_v0 = vld [vmem:[%s363_s1 + $0x38] sm:$0xff]  ;;  %v267_v1 = vld [vmem:[%s363_s1 + $0x30] sm:$0xff]  ;;  %v266_v4 = vld [vmem:[%s363_s1 + $0x28] sm:$0xff] }
   0x2   :  { %89 = vmatpush.bf16.msra.mxu0 %v268_v0  ;;  %v276_v2 = vld [vmem:[%s364_s2 + $0x38] sm:$0xff]  ;;  %v275_v3 = vld [vmem:[%s364_s2 + $0x30] sm:$0xff]  ;;  %v274_v5 = vld [vmem:[%s364_s2 + $0x28] sm:$0xff] }
   0x3   :  { %172 = vmatpush.bf16.msra.mxu1 %v276_v2  ;;  %v265_v6 = vld [vmem:[%s363_s1 + $0x20] sm:$0xff]  ;;  %v264_v8 = vld [vmem:[%s363_s1 + $0x18] sm:$0xff]  ;;  %v263_v10 = vld [vmem:[%s363_s1 + $0x10] sm:$0xff] }
   0x4   :  { %v273_v7 = vld [vmem:[%s364_s2 + $0x20] sm:$0xff]  ;;  %v272_v9 = vld [vmem:[%s364_s2 + $0x18] sm:$0xff]  ;;  %v262_v11 = vld [vmem:[%s363_s1 + $0x8] sm:$0xff] }
   0x5   :  { %v261_v12 = vld [vmem:[%s363_s1] sm:$0xff]  ;;  %v271_v14 = vld [vmem:[%s364_s2 + $0x10] sm:$0xff]  ;;  %v270_v15 = vld [vmem:[%s364_s2 + $0x8] sm:$0xff] }
   0x6   :  { %90 = vmatpush.bf16.msra.mxu0 %v267_v1  ;;  %v260_v13 = vld [vmem:[%s365_s0] sm:$0xff] }
   0x7   :  { %173 = vmatpush.bf16.msra.mxu1 %v275_v3  ;;  %v269_v16 = vld [vmem:[%s364_s2] sm:$0xff] }
   0x8   :  { %v277_v20 = vld [vmem:[%s366_s3] ss:$0 sm:$0xff] }
   0xa   :  { %91 = vmatpush.bf16.msra.mxu0 %v266_v4 }
   0xb   :  { %174 = vmatpush.bf16.msra.mxu1 %v274_v5 }
   0xe   :  { %92 = vmatpush.bf16.msra.mxu0 %v265_v6 }
   0xf   :  { %175 = vmatpush.bf16.msra.mxu1 %v273_v7 }
  0x12   :  { %93 = vmatpush.bf16.msra.mxu0 %v264_v8 }
  0x13   :  { %176 = vmatpush.bf16.msra.mxu1 %v272_v9 }
  0x16   :  { %94 = vmatpush.bf16.msra.mxu0 %v263_v10 }
  0x17   :  { %177 = vmatpush.bf16.msra.mxu1 %v271_v14 }
  0x1a   :  { %95 = vmatpush.bf16.msra.mxu0 %v262_v11 }
  0x1b   :  { %178 = vmatpush.bf16.msra.mxu1 %v270_v15 }
  0x1e   :  { %96 = vmatpush.bf16.msra.mxu0 %v261_v12 }
  0x1f   :  { %179 = vmatpush.bf16.msra.mxu1 %v269_v16 }
  0x21   :  { %97 = vmatmul.bf16.vlgmr.msra.gmra.mxu0 %v260_v13 }
  0x9e   :  { %v98_v17 = vpop.f32.mrf.mxu0 }
  0xa6   :  { %v100_v18 = vpop.f32.mrf.mxu0 }
  0xa7   :  { %v103_v19 = vpack.c.bf16 %v100_v18, %v98_v17 }
  0xa9   :  { %180 = vmatmul.bf16.vlgmr.msra.gmra.mxu1 %v103_v19 }
 0x126   :  { %v181_v21 = vpop.f32.mrf.mxu1 }
 0x127   :  { %v182_v22 = vadd.f32 %v277_v20, %v181_v21 }
 0x129   :  { %186 = vst [vmem:[%s367_s4] sm:$0xff] %v182_v22 }
 0x12e   :  { %v183_v23 = vpop.f32.mrf.mxu1 }
 0x12f   :  { %v184_v24 = vadd.f32 %v277_v20, %v183_v23 }
 0x131   :  { %187 = vst [vmem:[%s367_s4 + $0x8] sm:$0xff] %v184_v24 }

</bundles_post_ra>
